<compile_context>
chip_gen: v5e
topology: v5e:2x2
jax: 0.10.0
libtpu: 0.0.40
codegen_flags: <defaults>
</compile_context>

<pallas_src>
import functools

import jax
import jax.numpy as jnp
from jax.experimental import pallas as pl
from jax.experimental.pallas import tpu as pltpu


# ----------------------------------------------------------------------------
# erf-based GELU from guaranteed-supported ops (exp / abs / where / mul / add)
# ----------------------------------------------------------------------------
_ERF_A1 = 0.254829592
_ERF_A2 = -0.284496736
_ERF_A3 = 1.421413741
_ERF_A4 = -1.453152027
_ERF_A5 = 1.061405429
_ERF_P = 0.3275911
_INV_SQRT2 = 0.7071067811865476


def _erf_approx(x):
    # Abramowitz & Stegun 7.1.26, |error| <= 1.5e-7 (f32).
    ax = jnp.abs(x)
    t = 1.0 / (1.0 + _ERF_P * ax)
    poly = ((((_ERF_A5 * t + _ERF_A4) * t + _ERF_A3) * t + _ERF_A2) * t
            + _ERF_A1) * t
    y = 1.0 - poly * jnp.exp(-(ax * ax))
    return jnp.where(x < 0, -y, y)


def _gelu_erf(x):
    return 0.5 * x * (1.0 + _erf_approx(x * _INV_SQRT2))


# ----------------------------------------------------------------------------
# Pallas kernels
# ----------------------------------------------------------------------------
def transform_kernel(x_ref, wd_ref, bd_ref, g_ref, b_ref, h_ref, *, eps):
    """dense(H,H) -> erf-gelu -> LayerNorm, one row tile per grid step."""
    h = jnp.dot(x_ref[...].astype(jnp.bfloat16),
                wd_ref[...].astype(jnp.bfloat16),
                preferred_element_type=jnp.float32) + bd_ref[...]
    h = _gelu_erf(h)
    mean = jnp.mean(h, axis=-1, keepdims=True)
    var = jnp.mean((h - mean) ** 2, axis=-1, keepdims=True)
    h = (h - mean) * jax.lax.rsqrt(var + eps)
    h = h * g_ref[...] + b_ref[...]
    h_ref[...] = h.astype(h_ref.dtype)


def decoder_kernel(h_ref, wdec_ref, bdec_ref, out_ref):
    """Vocab-tiled decoder matmul; bf16 operands, f32 accumulation."""
    out_ref[...] = (
        jnp.dot(h_ref[...], wdec_ref[...],
                preferred_element_type=jnp.float32)
        + bdec_ref[...]).astype(out_ref.dtype)


def linear_kernel(x_ref, w_ref, b_ref, out_ref):
    out_ref[...] = (
        jnp.dot(x_ref[...].astype(jnp.bfloat16),
                w_ref[...].astype(jnp.bfloat16),
                preferred_element_type=jnp.float32)
        + b_ref[...]).astype(out_ref.dtype)


# ----------------------------------------------------------------------------
# Wrappers around pallas_call
# ----------------------------------------------------------------------------
def lm_head_transform(x, w_dense, b_dense, gamma, beta, *, eps,
                      tile_rows=1024, h_dtype=jnp.bfloat16):
    rows, hidden = x.shape
    tm = rows if rows <= tile_rows else tile_rows
    grid = (pl.cdiv(rows, tm),)

    cost = pl.CostEstimate(
        flops=2 * rows * hidden * hidden,
        transcendentals=rows * hidden,          # exp inside the erf-gelu
        bytes_accessed=int(x.size * x.dtype.itemsize
                           + w_dense.size * w_dense.dtype.itemsize
                           + rows * hidden * jnp.dtype(h_dtype).itemsize))

    return pl.pallas_call(
        functools.partial(transform_kernel, eps=eps),
        out_shape=jax.ShapeDtypeStruct((rows, hidden), h_dtype),
        grid_spec=pltpu.PrefetchScalarGridSpec(
            num_scalar_prefetch=0,
            grid=grid,
            in_specs=[
                pl.BlockSpec((tm, hidden), lambda i: (i, 0)),      # streamed rows
                pl.BlockSpec((hidden, hidden), lambda i: (0, 0)),  # resident W_dense
                pl.BlockSpec((1, hidden), lambda i: (0, 0)),       # resident b_dense
                pl.BlockSpec((1, hidden), lambda i: (0, 0)),       # resident gamma
                pl.BlockSpec((1, hidden), lambda i: (0, 0)),       # resident beta
            ],
            out_specs=pl.BlockSpec((tm, hidden), lambda i: (i, 0)),
        ),
        compiler_params=pltpu.CompilerParams(
            dimension_semantics=("parallel",)),
        cost_estimate=cost,
    )(x, w_dense, b_dense, gamma, beta)


def lm_head_decoder(h, w_dec, b_dec, *, tile_rows=1024, tile_vocab=2048,
                    out_dtype=jnp.float32,
                    vmem_limit_bytes=56 * 1024 * 1024):
    rows, hidden = h.shape
    vocab = w_dec.shape[1]
    tm = rows if rows <= tile_rows else tile_rows
    tn = vocab if vocab <= tile_vocab else tile_vocab
    # Vocab is the OUTER grid axis, rows inner: each W_dec tile is loaded from
    # HBM exactly once; only the small bf16 `h` slab is re-streamed.
    grid = (pl.cdiv(vocab, tn), pl.cdiv(rows, tm))

    cost = pl.CostEstimate(
        flops=2 * rows * hidden * vocab,
        transcendentals=0,
        bytes_accessed=int(h.size * h.dtype.itemsize
                           + w_dec.size * w_dec.dtype.itemsize
                           + rows * vocab * jnp.dtype(out_dtype).itemsize))

    return pl.pallas_call(
        decoder_kernel,
        out_shape=jax.ShapeDtypeStruct((rows, vocab), out_dtype),
        grid_spec=pltpu.PrefetchScalarGridSpec(
            num_scalar_prefetch=0,
            grid=grid,
            in_specs=[
                pl.BlockSpec((tm, hidden), lambda j, i: (i, 0)),   # h (bf16)
                pl.BlockSpec((hidden, tn), lambda j, i: (0, j)),   # W_dec tile (bf16)
                pl.BlockSpec((1, tn), lambda j, i: (0, j)),        # decoder bias tile
            ],
            out_specs=pl.BlockSpec((tm, tn), lambda j, i: (i, j)),
        ),
        compiler_params=pltpu.CompilerParams(
            dimension_semantics=("parallel", "parallel"),
            vmem_limit_bytes=vmem_limit_bytes,
        ),
        cost_estimate=cost,
    )(h, w_dec, b_dec)


def seq_relationship_head(pooled, w_padded, b_padded, *, nout):
    """(B, H) @ (H, 2) linear; computed with a 128-lane padded output so the
    store is lane-dense, then sliced back to `nout` columns."""
    rows, hidden = pooled.shape
    npad = w_padded.shape[1]
    out = pl.pallas_call(
        linear_kernel,
        out_shape=jax.ShapeDtypeStruct((rows, npad), jnp.float32),
        grid=(1,),
        in_specs=[pl.BlockSpec((rows, hidden), lambda i: (0, 0)),
                  pl.BlockSpec((hidden, npad), lambda i: (0, 0)),
                  pl.BlockSpec((1, npad), lambda i: (0, 0))],
        out_specs=pl.BlockSpec((rows, npad), lambda i: (0, 0)),
    )(pooled, w_padded, b_padded)
    return out[:, :nout]


# ----------------------------------------------------------------------------
# VisualBertPreTrainingHeads (forward only, deterministic synthetic params)
# ----------------------------------------------------------------------------
class VisualBertPreTrainingHeadsPallas:
    def __init__(self, key, *, hidden_size, vocab_size, layer_norm_eps=1e-12):
        kd_w, kd_b, kdec, ksr_w, ksr_b = jax.random.split(key, 5)
        bound = 1.0 / (hidden_size ** 0.5)
        uni = lambda k, shape: jax.random.uniform(
            k, shape, jnp.float32, -bound, bound)

        # predictions.transform.dense (weights stored pre-transposed: (in, out))
        self.dense_w = uni(kd_w, (hidden_size, hidden_size))
        self.dense_b = uni(kd_b, (1, hidden_size))
        # predictions.transform.LayerNorm
        self.ln_gamma = jnp.ones((1, hidden_size), jnp.float32)
        self.ln_beta = jnp.zeros((1, hidden_size), jnp.float32)
        self.eps = layer_norm_eps
        # predictions.decoder — stored bf16 in HBM (dominant weight stream);
        # bias is the tied zero-initialized parameter (f32).
        self.decoder_w = uni(kdec, (hidden_size, vocab_size)).astype(jnp.bfloat16)
        self.decoder_b = jnp.zeros((1, vocab_size), jnp.float32)
        # seq_relationship (kept at logical shape + a 128-lane padded copy for
        # the lane-dense kernel store)
        self.seq_rel_w = uni(ksr_w, (hidden_size, 2))
        self.seq_rel_b = uni(ksr_b, (1, 2))
        npad = 128
        self.seq_rel_w_pad = jnp.zeros((hidden_size, npad), jnp.float32
                                       ).at[:, :2].set(self.seq_rel_w)
        self.seq_rel_b_pad = jnp.zeros((1, npad), jnp.float32
                                       ).at[:, :2].set(self.seq_rel_b)

        self.hidden_size = hidden_size
        self.vocab_size = vocab_size

    def __call__(self, sequence_output, pooled_output, *,
                 tile_rows=1024, tile_vocab=2048):
        B, S, H = sequence_output.shape
        x = sequence_output.reshape(B * S, H)
        # 1) transform: dense + erf-gelu + LayerNorm  -> bf16 hidden
        h = lm_head_transform(x, self.dense_w, self.dense_b,
                              self.ln_gamma, self.ln_beta,
                              eps=self.eps, tile_rows=tile_rows)
        # 2) decoder: vocab-outer tiling, W_dec streamed exactly once
        prediction_scores = lm_head_decoder(
            h, self.decoder_w, self.decoder_b,
            tile_rows=tile_rows, tile_vocab=tile_vocab,
        ).reshape(B, S, self.vocab_size)
        # 3) seq_relationship
        seq_relationship_score = seq_relationship_head(
            pooled_output, self.seq_rel_w_pad, self.seq_rel_b_pad, nout=2)
        return prediction_scores, seq_relationship_score

    # pure-JAX reference for verification (same bf16-in / f32-acc dot recipe,
    # but with the exact erf-based GELU)
    def reference(self, sequence_output, pooled_output):
        h = jnp.dot(sequence_output.astype(jnp.bfloat16),
                    self.dense_w.astype(jnp.bfloat16),
                    preferred_element_type=jnp.float32) + self.dense_b[0]
        h = jax.nn.gelu(h, approximate=False)
        mean = jnp.mean(h, axis=-1, keepdims=True)
        var = jnp.mean((h - mean) ** 2, axis=-1, keepdims=True)
        h = (h - mean) * jax.lax.rsqrt(var + self.eps) * self.ln_gamma[0] \
            + self.ln_beta[0]
        scores = jnp.dot(h.astype(jnp.bfloat16), self.decoder_w,
                         preferred_element_type=jnp.float32) + self.decoder_b[0]
        seq_rel = jnp.dot(pooled_output.astype(jnp.bfloat16),
                          self.seq_rel_w.astype(jnp.bfloat16),
                          preferred_element_type=jnp.float32) + self.seq_rel_b[0]
        return scores, seq_rel


if __name__ == "__main__":
    key = jax.random.PRNGKey(0)
    k_param, k_seq, k_pool = jax.random.split(key, 3)

    # Small config; tiles shrunk so both LM-head grids have >1 step per axis,
    # exercising the row-tiled transform and the (vocab-outer, row-inner)
    # decoder streaming paths.
    B, S, H, VOCAB = 2, 8, 32, 256

    heads = VisualBertPreTrainingHeadsPallas(
        k_param, hidden_size=H, vocab_size=VOCAB, layer_norm_eps=1e-12)

    sequence_output = jax.random.normal(k_seq, (B, S, H), jnp.float32)
    pooled_output = jax.random.normal(k_pool, (B, H), jnp.float32)

    scores, seq_rel = heads(sequence_output, pooled_output,
                            tile_rows=8, tile_vocab=128)
    scores = jax.block_until_ready(scores)
    seq_rel = jax.block_until_ready(seq_rel)

    ref_scores, ref_seq_rel = heads.reference(sequence_output, pooled_output)

    assert scores.shape == (B, S, VOCAB), scores.shape
    assert seq_rel.shape == (B, 2), seq_rel.shape
    assert jnp.allclose(scores, ref_scores, atol=2e-2, rtol=2e-2), \
        float(jnp.max(jnp.abs(scores - ref_scores)))
    assert jnp.allclose(seq_rel, ref_seq_rel, atol=2e-2, rtol=2e-2), \
        float(jnp.max(jnp.abs(seq_rel - ref_seq_rel)))

    print("KERNEL_OK")
</pallas_src>

<mosaic_0001>
module attributes {stable_mosaic.version = 11 : i64} {
  func.func @transform_kernel(%arg0: i32, %arg1: memref<8x32xf32, #tpu.memory_space<vmem>>, %arg2: memref<32x32xf32, #tpu.memory_space<vmem>>, %arg3: memref<1x32xf32, #tpu.memory_space<vmem>>, %arg4: memref<1x32xf32, #tpu.memory_space<vmem>>, %arg5: memref<1x32xf32, #tpu.memory_space<vmem>>, %arg6: memref<8x32xbf16, #tpu.memory_space<vmem>>) attributes {dimension_semantics = [#tpu.dimension_semantics<parallel>], iteration_bounds = array<i64: 2>, scalar_prefetch = 0 : i64, scratch_operands = 0 : i64, tpu.core_type = #tpu.core_type<tc>, window_params = [{transform_indices = @transform_0, window_bounds = array<i64: 8, 32>}, {pipeline_mode = #tpu.pipeline_mode<synchronous>, transform_indices = @transform_1, window_bounds = array<i64: 32, 32>}, {pipeline_mode = #tpu.pipeline_mode<synchronous>, transform_indices = @transform_2, window_bounds = array<i64: 1, 32>}, {pipeline_mode = #tpu.pipeline_mode<synchronous>, transform_indices = @transform_3, window_bounds = array<i64: 1, 32>}, {pipeline_mode = #tpu.pipeline_mode<synchronous>, transform_indices = @transform_4, window_bounds = array<i64: 1, 32>}, {transform_indices = @transform_5, window_bounds = array<i64: 8, 32>}]} {
    %c0 = arith.constant 0 : index
    %c0_0 = arith.constant 0 : index
    %0 = vector.load %arg1[%c0, %c0_0] : memref<8x32xf32, #tpu.memory_space<vmem>>, vector<8x32xf32>
    %1 = arith.truncf %0 : vector<8x32xf32> to vector<8x32xbf16>
    %c0_1 = arith.constant 0 : index
    %c0_2 = arith.constant 0 : index
    %2 = vector.load %arg2[%c0_1, %c0_2] : memref<32x32xf32, #tpu.memory_space<vmem>>, vector<32x32xf32>
    %3 = arith.truncf %2 : vector<32x32xf32> to vector<32x32xbf16>
    %cst = arith.constant dense<0.000000e+00> : vector<8x32xf32>
    %4 = tpu.matmul %1, %3, %cst {dimension_numbers = #tpu.dot_dimension_numbers<[1], [0], [0], [1], [0, 0, 1, 1], [], []>} : vector<8x32xbf16>, vector<32x32xbf16>, vector<8x32xf32> -> vector<8x32xf32>
    %c0_3 = arith.constant 0 : index
    %c0_4 = arith.constant 0 : index
    %5 = vector.load %arg3[%c0_3, %c0_4] : memref<1x32xf32, #tpu.memory_space<vmem>>, vector<1x32xf32>
    %6 = vector.broadcast %5 : vector<1x32xf32> to vector<8x32xf32>
    %7 = arith.addf %4, %6 : vector<8x32xf32>
    %cst_5 = arith.constant 5.000000e-01 : f32
    %8 = vector.broadcast %cst_5 : f32 to vector<8x32xf32>
    %9 = arith.mulf %8, %7 : vector<8x32xf32>
    %cst_6 = arith.constant 0.707106769 : f32
    %10 = vector.broadcast %cst_6 : f32 to vector<8x32xf32>
    %11 = arith.mulf %7, %10 : vector<8x32xf32>
    %12 = math.absf %11 : vector<8x32xf32>
    %cst_7 = arith.constant 0.327591091 : f32
    %13 = vector.broadcast %cst_7 : f32 to vector<8x32xf32>
    %14 = arith.mulf %13, %12 : vector<8x32xf32>
    %cst_8 = arith.constant 1.000000e+00 : f32
    %15 = vector.broadcast %cst_8 : f32 to vector<8x32xf32>
    %16 = arith.addf %15, %14 : vector<8x32xf32>
    %cst_9 = arith.constant 1.000000e+00 : f32
    %17 = vector.broadcast %cst_9 : f32 to vector<8x32xf32>
    %18 = arith.divf %17, %16 : vector<8x32xf32>
    %cst_10 = arith.constant 1.06140542 : f32
    %19 = vector.broadcast %cst_10 : f32 to vector<8x32xf32>
    %20 = arith.mulf %19, %18 : vector<8x32xf32>
    %cst_11 = arith.constant -1.45315206 : f32
    %21 = vector.broadcast %cst_11 : f32 to vector<8x32xf32>
    %22 = arith.addf %20, %21 : vector<8x32xf32>
    %23 = arith.mulf %22, %18 : vector<8x32xf32>
    %cst_12 = arith.constant 1.42141378 : f32
    %24 = vector.broadcast %cst_12 : f32 to vector<8x32xf32>
    %25 = arith.addf %23, %24 : vector<8x32xf32>
    %26 = arith.mulf %25, %18 : vector<8x32xf32>
    %cst_13 = arith.constant -0.284496725 : f32
    %27 = vector.broadcast %cst_13 : f32 to vector<8x32xf32>
    %28 = arith.addf %26, %27 : vector<8x32xf32>
    %29 = arith.mulf %28, %18 : vector<8x32xf32>
    %cst_14 = arith.constant 0.254829586 : f32
    %30 = vector.broadcast %cst_14 : f32 to vector<8x32xf32>
    %31 = arith.addf %29, %30 : vector<8x32xf32>
    %32 = arith.mulf %31, %18 : vector<8x32xf32>
    %33 = arith.mulf %12, %12 : vector<8x32xf32>
    %cst_15 = arith.constant 0.000000e+00 : f32
    %34 = vector.broadcast %cst_15 : f32 to vector<8x32xf32>
    %35 = arith.subf %34, %33 : vector<8x32xf32>
    %36 = math.exp %35 : vector<8x32xf32>
    %37 = arith.mulf %32, %36 : vector<8x32xf32>
    %cst_16 = arith.constant 1.000000e+00 : f32
    %38 = vector.broadcast %cst_16 : f32 to vector<8x32xf32>
    %39 = arith.subf %38, %37 : vector<8x32xf32>
    %cst_17 = arith.constant 0.000000e+00 : f32
    %40 = vector.broadcast %cst_17 : f32 to vector<8x32xf32>
    %41 = arith.cmpf olt, %11, %40 : vector<8x32xf32>
    %cst_18 = arith.constant 0.000000e+00 : f32
    %42 = vector.broadcast %cst_18 : f32 to vector<8x32xf32>
    %43 = arith.subf %42, %39 : vector<8x32xf32>
    %44 = arith.select %41, %43, %39 : vector<8x32xi1>, vector<8x32xf32>
    %cst_19 = arith.constant 1.000000e+00 : f32
    %45 = vector.broadcast %cst_19 : f32 to vector<8x32xf32>
    %46 = arith.addf %45, %44 : vector<8x32xf32>
    %47 = arith.mulf %9, %46 : vector<8x32xf32>
    %cst_20 = arith.constant dense<0.000000e+00> : vector<8xf32>
    %48 = vector.multi_reduction <add>, %47, %cst_20 [1] : vector<8x32xf32> to vector<8xf32>
    %49 = vector.shape_cast %48 : vector<8xf32> to vector<8x1xf32>
    %cst_21 = arith.constant 3.200000e+01 : f32
    %50 = vector.broadcast %cst_21 : f32 to vector<8x1xf32>
    %51 = arith.divf %49, %50 : vector<8x1xf32>
    %52 = vector.broadcast %51 : vector<8x1xf32> to vector<8x32xf32>
    %53 = arith.subf %47, %52 : vector<8x32xf32>
    %54 = arith.mulf %53, %53 : vector<8x32xf32>
    %cst_22 = arith.constant dense<0.000000e+00> : vector<8xf32>
    %55 = vector.multi_reduction <add>, %54, %cst_22 [1] : vector<8x32xf32> to vector<8xf32>
    %56 = vector.shape_cast %55 : vector<8xf32> to vector<8x1xf32>
    %cst_23 = arith.constant 3.200000e+01 : f32
    %57 = vector.broadcast %cst_23 : f32 to vector<8x1xf32>
    %58 = arith.divf %56, %57 : vector<8x1xf32>
    %59 = vector.broadcast %51 : vector<8x1xf32> to vector<8x32xf32>
    %60 = arith.subf %47, %59 : vector<8x32xf32>
    %cst_24 = arith.constant 9.99999996E-13 : f32
    %61 = vector.broadcast %cst_24 : f32 to vector<8x1xf32>
    %62 = arith.addf %58, %61 : vector<8x1xf32>
    %63 = math.rsqrt %62 : vector<8x1xf32>
    %64 = vector.broadcast %63 : vector<8x1xf32> to vector<8x32xf32>
    %65 = arith.mulf %60, %64 : vector<8x32xf32>
    %c0_25 = arith.constant 0 : index
    %c0_26 = arith.constant 0 : index
    %66 = vector.load %arg4[%c0_25, %c0_26] : memref<1x32xf32, #tpu.memory_space<vmem>>, vector<1x32xf32>
    %67 = vector.broadcast %66 : vector<1x32xf32> to vector<8x32xf32>
    %68 = arith.mulf %65, %67 : vector<8x32xf32>
    %c0_27 = arith.constant 0 : index
    %c0_28 = arith.constant 0 : index
    %69 = vector.load %arg5[%c0_27, %c0_28] : memref<1x32xf32, #tpu.memory_space<vmem>>, vector<1x32xf32>
    %70 = vector.broadcast %69 : vector<1x32xf32> to vector<8x32xf32>
    %71 = arith.addf %68, %70 : vector<8x32xf32>
    %72 = arith.truncf %71 : vector<8x32xf32> to vector<8x32xbf16>
    %c0_29 = arith.constant 0 : index
    %c0_30 = arith.constant 0 : index
    %73 = vector.load %arg6[%c0_29, %c0_30] : memref<8x32xbf16, #tpu.memory_space<vmem>>, vector<8x32xbf16>
    tpu.vector_store %arg6[%c0_29, %c0_30], %72 {strides = array<i32>} : memref<8x32xbf16, #tpu.memory_space<vmem>>, vector<8x32xbf16>,
    return
  }
  func.func @transform_0(%arg0: i32) -> (i32, i32) {
    %c0_i32 = arith.constant 0 : i32
    %c0_i32_0 = arith.constant 0 : i32
    return %arg0, %c0_i32 : i32, i32
  }
  func.func @transform_1(%arg0: i32) -> (i32, i32) {
    %c0_i32 = arith.constant 0 : i32
    %c0_i32_0 = arith.constant 0 : i32
    %c0_i32_1 = arith.constant 0 : i32
    return %c0_i32, %c0_i32_0 : i32, i32
  }
  func.func @transform_2(%arg0: i32) -> (i32, i32) {
    %c0_i32 = arith.constant 0 : i32
    %c0_i32_0 = arith.constant 0 : i32
    %c0_i32_1 = arith.constant 0 : i32
    return %c0_i32, %c0_i32_0 : i32, i32
  }
  func.func @transform_3(%arg0: i32) -> (i32, i32) {
    %c0_i32 = arith.constant 0 : i32
    %c0_i32_0 = arith.constant 0 : i32
    %c0_i32_1 = arith.constant 0 : i32
    return %c0_i32, %c0_i32_0 : i32, i32
  }
  func.func @transform_4(%arg0: i32) -> (i32, i32) {
    %c0_i32 = arith.constant 0 : i32
    %c0_i32_0 = arith.constant 0 : i32
    %c0_i32_1 = arith.constant 0 : i32
    return %c0_i32, %c0_i32_0 : i32, i32
  }
  func.func @transform_5(%arg0: i32) -> (i32, i32) {
    %c0_i32 = arith.constant 0 : i32
    %c0_i32_0 = arith.constant 0 : i32
    return %arg0, %c0_i32 : i32, i32
  }
}

</mosaic_0001>

<bundles_post_ra>
// kernel: tpu_custom_call.1
= control target key start
LH: loop header
LB: loop body
LE: loop exit
PB: predicated region body
PF: predicated region fallthrough
CT: control target
= control target key end

     0   :  { %10 = vsyncpa [#allocation3], 0  ;;  %s868_s0 = inlined_call_operand.hbm [shape: f32[16,32], index: 0, kind: input, shape index: {}]   ;;  %s869_s1 = inlined_call_operand.hbm [shape: f32[32,32], index: 1, kind: input, shape index: {}]   ;;  %s870_s2 = inlined_call_operand.vmem [shape: f32[1,32], index: 2, kind: input, shape index: {}]   ;;  %s871_s3 = inlined_call_operand.vmem [shape: f32[1,32], index: 3, kind: input, shape index: {}]   ;;  %s872_s4 = inlined_call_operand.vmem [shape: f32[1,32], index: 4, kind: input, shape index: {}]   ;;  %s873_s5 = inlined_call_operand.hbm [shape: bf16[16,32], index: 5, kind: output, shape index: {}]  }
   0x1   :  { %12 = vsyncpa [#allocation3 + $0x1], 0 }
   0x2   :  { %13 = vsyncpa [#allocation6], 0 }
   0x3   :  { %14 = vsyncpa [#allocation4], 0 }
   0x4   :  { %16 = vsyncpa [#allocation4 + $0x1], 0  ;;  %s719_s18 = smov 0   ;;  %s721_s19 = smov 0  }
   0x5   :  { %s723_s20 = smov 0   ;;  %s725_s21 = smov 0  }
   0x6 LB: > { %s174_s24 = sshll.u32 %s869_s1, 4  ;;  %s743_s25 = sadd.s32 4294967295, %s683_s21   ;;  %s683_s21 = sphi %s725_s21, %s883_s21   ;;  %s679_s20 = sphi %s723_s20, %s882_s20   ;;  %s675_s19 = sphi %s721_s19, %s881_s19   ;;  %s671_s18 = sphi %s719_s18, %s880_s18   ;;  %s175_s24 = int_to_ptr.hbm [resolvable:$true] %s174_s24 }
   0x7   : > { %p468_p0 = scmp.ge.s32.totalorder %s683_s21, 1  ;;  %p43_p1 = scmp.eq.s32.totalorder %s743_s25, 0 }
   0x8   : > { %p163_p2 = scmp.lt.s32.totalorder %s683_s21, 3  ;;  %s685_s27 = smov [#allocation5]  }
   0x9   : > { %s176_s28 = sshll.u32 %s685_s27, 4  ;;  %s686_s29 = smov 128   ;;  %s177_s28 = int_to_ptr.vmem [resolvable:$true] %s176_s28 }
   0xa   : > { %p748_p3 = pnand %p468_p0, %p163_p2  ;;  %s687_s30 = smov 8  }
   0xb   : > { %s467_s6 = sadd.s32 4294967294, %s683_s21   ;;  %s759_s7 = sadd.s32 1, %s683_s21  }
   0xc   : > { %p490_p4 = pneg %p748_p3  ;;  %s29_s8 = sadd.s32 1, %s679_s20 }
   0xd   : > { %s26_s9 = ssub.s32 %s683_s21, %s759_s7  ;;  %p36_p7 = scmp.ne.s32.totalorder %s679_s20, %s675_s19 }
   0xe   : > { %p491_p6 = pnand %p490_p4, %p43_p1  ;;  %p27_p8 = scmp.eq.s32.totalorder %s26_s9, 0 }
   0xf   : > { %p37_p9 = scmp.eq.s32.totalorder %s683_s21, 0  ;;  %p42_p10 = scmp.ne.s32.totalorder %s675_s19, %s671_s18 }
  0x10   : > { %493 = dma.hbm_to_vmem [thread:$0]  (!%p491_p6), %s175_s24, 512, %s177_s28, [#allocation6], %s686_s29, %s686_s29, %s687_s30  }
  0x11   : > { %p150_p11 = scmp.eq.s32.totalorder %s743_s25, 1  ;;  %p775_p12 = por %p43_p1, %p42_p10 }
  0x12   : > { %s771_s10 = scalar_select %p27_p8, %s679_s20, %s29_s8  }
  0x13   : > { %p779_p13 = por %p150_p11, %p36_p7  ;;  %p156_p0 = scmp.eq.s32.totalorder %s467_s6, 1 }
  0x14   : > { %p38_p2 = por %p37_p9, %p36_p7  ;;  %s199_s13 = sand.u32 1, %s679_s20  }
  0x15   : > { %p784_p4 = por %p156_p0, %p42_p10  ;;  %p503_p6 = scmp.lt.s32.totalorder %s683_s21, 2 }
  0x16   : > { %s471_s15 = sshll.u32 %s199_s13, 3  ;;  %s472_s16 = sshll.u32 %s683_s21, 3 }
  0x17   : > { %s207_s23 = scalar_lea.hbm %s868_s0, %s472_s16  ;;  %s203_s27 = scalar_lea.vmem [#allocation2], %s471_s15 }
  0x18   : > { %s209_s24 = sshll.u32 %s207_s23, 4  ;;  %s211_s28 = sshll.u32 %s203_s27, 4  ;;  %s210_s24 = int_to_ptr.hbm [resolvable:$true] %s209_s24  ;;  %s212_s28 = int_to_ptr.vmem [resolvable:$true] %s211_s28 }
  0x19   : > { %p793_p8 = pnand %p503_p6, %p38_p2  ;;  %s200_s30 = scalar_lea.sflag [#allocation3], %s199_s13 }
  0x1a   : > { %s583_s6 = sshra.s32 %s210_s24, 4  ;;  %s590_s15 = scalar_lea.hbm %s868_s0, 16  ;;  %s584_s6 = int_to_ptr.hbm [resolvable:$true] %s583_s6 }
  0x1b   : > { %s585_s8 = scalar_lea.hbm %s584_s6, 8  ;;  %p587_p9 = pneg %p793_p8 }
  0x1c   : > { %p586_p7 = scmp.ne.s32.totalorder %s584_s6, %s585_s8  ;;  %p591_p0 = scmp.lt.s32.totalorder %s584_s6, %s868_s0 }
  0x1d   : > { %p592_p2 = scmp.lt.s32.totalorder %s590_s15, %s585_s8 }
  0x1e   : > { %p588_p10 = pnand %p587_p9, %p586_p7 }
  0x1f   : > { %p593_p6 = por %p592_p2, %p591_p0 }
  0x20   : > { %p589_p11 = pneg %p588_p10 }
  0x22   : > { %p594_p5 = pnand %p593_p6, %p589_p11 }
  0x24   : > { %597 = shalt.err (!%p594_p5)
}
  0x25   : > { %497 = dma.hbm_to_vmem [thread:$0]  (!%p793_p8), %s210_s24, 128, %s212_s28, %s200_s30  }
  0x26   : > { %220 = sbr.rel (%p748_p3) target bundleno = 511 (0x1ff), region = 40  ;;  %s810_s13 = sand.u32 (!%p748_p3), 1, %s675_s19  }
  0x27   : > { %s474_s23 = sshll.u32 (!%p748_p3), %s810_s13, 3  ;;  %s223_s27 = scalar_lea.sflag (!%p748_p3), [#allocation3], %s810_s13 }
  0x28   : > { %s226_s9 = scalar_lea.vmem (!%p748_p3), [#allocation2], %s474_s23 }
  0x2b   : > { %658 = dma.done.wait (%p775_p12), %s223_s27, 128  }
  0x2c   : > { %660 = vsyncadd (%p775_p12), %s223_s27, 4294967168 }
  0x2d   : > { %662 = dma.done.wait (%p43_p1), [#allocation6], 512  }
  0x2e   : > { %664 = vsyncadd (%p43_p1), [#allocation6], 4294966784  ;;  %v264_v0 = vld [vmem:[#allocation5 + $0x10] sm:$0xff]  ;;  %v265_v1 = vld [vmem:[#allocation5 + $0x18] sm:$0xff]  ;;  %vm272_vm0 = vcmask 261120   ;;  %v688_v47 = vmov 32.0  }
  0x2f   : > { %v262_v2 = vld [vmem:[#allocation5] sm:$0xff]  ;;  %v267_v3 = vpack.c.bf16 %v265_v1, %v264_v0  ;;  %v263_v4 = vld [vmem:[#allocation5 + $0x8] sm:$0xff]  ;;  %v260_v6 = vld [vmem:[%s226_s9] sm:$0xff]  ;;  %s476_s24 = sshll.u32 %s810_s13, 2  ;;  %s479_s28 = sshll.u32 %s743_s25, 2  ;;  %vm369_vm10 = vcmask 257024  }
  0x30   : > { %v266_v5 = vpack.c.bf16 %v263_v4, %v262_v2  ;;  %v261_v7 = vpack.c.bf16 %v260_v6, %v260_v6  ;;  %v542_v8 = vld [vmem:[%s870_s2] ss:$0 sm:$0xff]  ;;  %s382_s17 = scalar_lea.hbm %s873_s5, %s479_s28  ;;  %s258_s22 = scalar_lea.vmem [#allocation7], %s476_s24 }
  0x31   : > { %282 = vmatpush.bf16.msra.mxu0 %v267_v3  ;;  %v543_v4 = vld [vmem:[%s871_s3] ss:$0 sm:$0xff]  ;;  %s384_s25 = sshll.u32 %s258_s22, 4  ;;  %s386_s23 = sshll.u32 %s382_s17, 4  ;;  %s385_s25 = int_to_ptr.vmem [resolvable:$true] %s384_s25  ;;  %s387_s23 = int_to_ptr.hbm [resolvable:$true] %s386_s23 }
  0x32   : > { %v544_v6 = vld [vmem:[%s872_s4] ss:$0 sm:$0xff]  ;;  %s372_s27 = scalar_lea.sflag [#allocation4], %s810_s13  ;;  %s627_s9 = sshra.s32 %s387_s23, 4  ;;  %s628_s9 = int_to_ptr.hbm [resolvable:$true] %s627_s9 }
  0x33   : > { %s629_s26 = scalar_lea.hbm %s628_s9, 4  ;;  %s633_s24 = scalar_lea.hbm %s873_s5, 8 }
  0x34   : > { %p630_p1 = scmp.ne.s32.totalorder %s628_s9, %s629_s26  ;;  %p634_p12 = scmp.lt.s32.totalorder %s628_s9, %s873_s5 }
  0x35   : > { %283 = vmatpush.bf16.msra.mxu0 %v266_v5  ;;  %p635_p8 = scmp.lt.s32.totalorder %s633_s24, %s629_s26 }
  0x36   : > { %p631_p3 = pnand %p630_p1, %p779_p13 }
  0x37   : > { %p636_p7 = por %p635_p8, %p634_p12 }
  0x38   : > { %477 = vmatmul.msk.bf16.vlgmr.msra.gmra.mxu0 %vm272_vm0, %v261_v7  ;;  %p632_p5 = pneg %p631_p3 }
  0x3a   : > { %p637_p9 = pnand %p636_p7, %p632_p5 }
  0xb5   : > { %v285_v9 = vpop.f32.mrf.mxu0 }
  0xb6   : > { %v286_v10 = vadd.f32 %v542_v8, %v285_v9 }
  0xb8   : > { %v290_v11 = vmul.f32 0.70710677, %v286_v10  ;;  %v289_v43 = vmul.f32 0.5, %v286_v10 }
  0xba   : > { %v291_v12 = vand.u32 2147483647, %v290_v11  ;;  %vm324_vm5 = vcmp.lt.f32.partialorder %v290_v11, 0.0 }
  0xbc   : > { %v292_v13 = vmul.f32 0.3275911, %v291_v12  ;;  %v318_v25 = vmul.f32 %v291_v12, %v291_v12 }
  0xbd   : > { %v287_v14 = vpop.f32.mrf.mxu0 }
  0xbe   : > { %v293_v15 = vadd.f32 1.0, %v292_v13  ;;  %v319_v29 = vsub.f32 0.0, %v318_v25 }
  0xc0   : > { %545 = vrcp.f32 %v293_v15  ;;  %v305_v19 = vand.u32 2147483648, %v293_v15  ;;  %v303_v21 = vand.u32 2147483647, %v293_v15  ;;  %vm299_vm2 = vweird.f32 %v293_v15 }
  0xc1   : > { %v320_v32 = vmul.f32 1.442695, %v319_v29 }
  0xc2   : > { %v306_v23 = vor.u32 1.1754944e-38, %v305_v19  ;;  %vm304_vm4 = vcmp.eq.f32.partialorder %v303_v21, 8.507059e+37 }
  0xc3   : > { %547 = vpow2.f32 %v320_v32 }
  0xc4   : > { %549 = vrcp.f32 %v688_v47 }
  0xc6   : > { %v546_v16 = vpop.eup %545 }
  0xc7   : > { %v295_v17 = vmul.f32 %v546_v16, %v293_v15  ;;  %vm300_vm1 = vweird.f32 %v546_v16 }
  0xc8   : > { %vm301_vm3 = vmor %vm299_vm2, %vm300_vm1 }
  0xc9   : > { %v296_v18 = vsub.f32 1.0, %v295_v17  ;;  %v548_v38 = vpop.eup %547 }
  0xca   : > { %v550_v48 = vpop.eup %549 }
  0xcb   : > { %v297_v20 = vmul.f32 %v546_v16, %v296_v18  ;;  %v333_v49 = vmul.f32 32.0, %v550_v48  ;;  %vm337_vm6 = vweird.f32 %v550_v48 }
  0xcd   : > { %v298_v22 = vadd.f32 %v546_v16, %v297_v20  ;;  %v334_v50 = vsub.f32 1.0, %v333_v49 }
  0xcf   : > { %v302_v24 = vsel %vm301_vm3, %v546_v16, %v298_v22  ;;  %v335_v51 = vmul.f32 %v550_v48, %v334_v50 }
  0xd0   : > { %v307_v26 = vsel %vm304_vm4, %v306_v23, %v302_v24 }
  0xd1   : > { %v309_v27 = vmul.f32 1.0614054, %v307_v26  ;;  %v336_v52 = vadd.f32 %v550_v48, %v335_v51 }
  0xd3   : > { %v310_v28 = vadd.f32 -1.4531521, %v309_v27  ;;  %v338_v53 = vsel %vm337_vm6, %v550_v48, %v336_v52 }
  0xd5   : > { %v311_v30 = vmul.f32 %v310_v28, %v307_v26 }
  0xd7   : > { %v312_v31 = vadd.f32 1.4214138, %v311_v30 }
  0xd9   : > { %v313_v33 = vmul.f32 %v312_v31, %v307_v26 }
  0xdb   : > { %v314_v34 = vadd.f32 -0.28449672, %v313_v33 }
  0xdd   : > { %v315_v35 = vmul.f32 %v314_v34, %v307_v26 }
  0xdf   : > { %v316_v36 = vadd.f32 0.2548296, %v315_v35 }
  0xe1   : > { %v317_v37 = vmul.f32 %v316_v36, %v307_v26 }
  0xe3   : > { %v322_v39 = vmul.f32 %v548_v38, %v317_v37 }
  0xe5   : > { %v323_v40 = vsub.f32 1.0, %v322_v39 }
  0xe7   : > { %v325_v41 = vsub.f32 0.0, %v323_v40 }
  0xe9   : > { %v326_v42 = vsel %vm324_vm5, %v325_v41, %v323_v40 }
  0xea   : > { %v327_v44 = vadd.f32 1.0, %v326_v42 }
  0xec   : > { %v328_v45 = vmul.f32 %v327_v44, %v289_v43 }
  0xee   : > { %v329_v46 = vsel %vm272_vm0, %v328_v45, 0.0 }
  0xef   : > { %330 = vadd.xlane.f32.xlu0 %v329_v46 }
 0x162   : > { %v331_v54 = vpop.xlane.xlu0 %330 }
 0x163   : > { %v339_v55 = vmul.f32 %v338_v53, %v331_v54 }
 0x165   : > { %v340_v56 = vsub.f32 %v328_v45, %v339_v55 }
 0x167   : > { %v341_v57 = vmul.f32 %v340_v56, %v340_v56 }
 0x169   : > { %v342_v58 = vsel %vm272_vm0, %v341_v57, 0.0 }
 0x16a   : > { %343 = vadd.xlane.f32.xlu0 %v342_v58 }
 0x1dd   : > { %v344_v59 = vpop.xlane.xlu0 %343 }
 0x1de   : > { %v345_v60 = vmul.f32 %v344_v59, %v338_v53 }
 0x1e0   : > { %v346_v61 = vadd.f32 1e-12, %v345_v60 }
 0x1e2   : > { %551 = vrsqrt.f32 %v346_v61  ;;  %vm353_vm8 = vweird.f32 %v346_v61 }
 0x1e8   : > { %v552_v62 = vpop.eup %551 }
 0x1e9   : > { %v348_v63 = vmul.f32 %v552_v62, %v346_v61  ;;  %vm354_vm7 = vweird.f32 %v552_v62 }
 0x1ea   : > { %vm355_vm9 = vmor %vm353_vm8, %vm354_vm7 }
 0x1eb   : > { %v349_v0 = vmul.f32 %v552_v62, %v348_v63 }
 0x1ed   : > { %v350_v1 = vmul.f32 0.5, %v349_v0 }
 0x1ef   : > { %v351_v2 = vsub.f32 1.5, %v350_v1 }
 0x1f1   : > { %v352_v3 = vmul.f32 %v552_v62, %v351_v2 }
 0x1f3   : > { %v356_v5 = vsel %vm355_vm9, %v552_v62, %v352_v3 }
 0x1f4   : > { %v357_v7 = vmul.f32 %v356_v5, %v340_v56 }
 0x1f6   : > { %v362_v8 = vmul.f32 %v543_v4, %v357_v7 }
 0x1f8   : > { %v367_v9 = vadd.f32 %v544_v6, %v362_v8 }
 0x1fa   : > { %v368_v10 = vpack.c.bf16 %v367_v9, %v367_v9 }
 0x1fc   : > { %370 = vst.msk [vmem:[%s258_s22] sm:$0xf] %vm369_vm10, %v368_v10 }
 0x1fd   : > { %640 = shalt.err (!%p637_p9)
}
 0x1fe   : > { %488 = dma.vmem_to_hbm [thread:$0]  (%p779_p13), %s385_s25, 64, %s387_s23, %s372_s27  }
 0x1ff PF: > { %s398_s13 = sand.u32 1, %s671_s18   ;;  %p879_p10 = scmp.ge.s32.totalorder %s683_s21, 2 }
 0x200   : > { %s399_s6 = scalar_lea.sflag [#allocation4], %s398_s13 }
 0x201   : > { %p499_p11 = pnand %p879_p10, %p784_p4 }
 0x203   : > { %p500_p0 = pneg %p499_p11 }
 0x205   : > { %666 = dma.done.wait (%p500_p0), %s399_s6, 64  }
 0x206   : > { %668 = vsyncadd (%p500_p0), %s399_s6, 4294967232  ;;  %p19_p2 = scmp.ge.s32.totalorder %s759_s7, 4   ;;  %s880_s18 = smov %s675_s19 }
 0x207   : > { %s881_s19 = smov %s679_s20  ;;  %s882_s20 = smov %s771_s10 }
 0x208   : > { %s883_s21 = smov %s759_s7  ;;  %21 = sbr.rel (!%p19_p2) target bundleno = 6 (0x6), region = 89 }
 0x20d   :  { %405 = vsyncpa [#allocation3], 1 }
 0x20e   :  { %407 = vsyncpa [#allocation3 + $0x1], 1 }
 0x20f   :  { %408 = vsyncpa [#allocation6], 1 }
 0x210   :  { %409 = vsyncpa [#allocation4], 1 }
 0x211   :  { %411 = vsyncpa [#allocation4 + $0x1], 1 }

</bundles_post_ra>
